<compile_context>
chip_gen: v5e
topology: v5e:2x2
jax: 0.10.0
libtpu: 0.0.40
codegen_flags: <defaults>
</compile_context>

<pallas_src>
import functools

import jax
import jax.numpy as jnp
from jax import lax
from jax.experimental import pallas as pl
from jax.experimental.pallas import tpu as pltpu

EPS = 1e-8  # matches F.cosine_similarity default eps


def _cdiv(a, b):
    return -(-a // b)


def _hf_loss_kernel(total_b, temp_ref, p_ref, a_ref, b_ref, labs_ref,
                    loss_part_ref, corr_part_ref, loss_acc, corr_acc):
    t = pl.program_id(1)
    nt = pl.num_programs(1)

    @pl.when(t == 0)
    def _init():
        loss_acc[...] = jnp.zeros_like(loss_acc)
        corr_acc[...] = jnp.zeros_like(corr_acc)

    p = p_ref[...].astype(jnp.float32)          # [TB, D]
    a = a_ref[...].astype(jnp.float32)          # [TB, D]
    b = b_ref[...].astype(jnp.float32)          # [TB, D]
    labs = labs_ref[...].astype(jnp.float32)    # [TB, 1]

    # Lane-axis reductions for the cosine similarities.
    dot_a = jnp.sum(p * a, axis=-1, keepdims=True)
    dot_b = jnp.sum(p * b, axis=-1, keepdims=True)
    np2 = jnp.sum(p * p, axis=-1, keepdims=True)
    na2 = jnp.sum(a * a, axis=-1, keepdims=True)
    nb2 = jnp.sum(b * b, axis=-1, keepdims=True)

    # cos = dot / max(|p||x|, eps) == dot * rsqrt(max(|p|^2 |x|^2, eps^2))
    sim_a = dot_a * lax.rsqrt(jnp.maximum(np2 * na2, EPS * EPS))   # [TB, 1]
    sim_b = dot_b * lax.rsqrt(jnp.maximum(np2 * nb2, EPS * EPS))   # [TB, 1]

    pred = (sim_b > sim_a).astype(jnp.float32)
    correct = (labs == pred).astype(jnp.float32)                   # [TB, 1]

    exp_temp = temp_ref[0, 0]  # exp(temp), precomputed scalar in SMEM
    margin = (2.0 * labs - 1.0) * (sim_b - sim_a) * exp_temp       # [TB, 1]
    # -log(sigmoid(m)) == softplus(-m): numerically stable form.
    loss = jnp.maximum(-margin, 0.0) + jnp.log(1.0 + jnp.exp(-jnp.abs(margin)))

    # Mask rows beyond the true batch size (partial last tile / overshooting
    # shard tiles whose index_map was clamped).
    tb = p.shape[0]
    base = (pl.program_id(0) * nt + t) * tb
    row_ids = base + lax.broadcasted_iota(jnp.int32, (tb, 1), 0)
    valid = row_ids < total_b

    loss_acc[...] += jnp.sum(jnp.where(valid, loss, 0.0), axis=0, keepdims=True)
    corr_acc[...] += jnp.sum(jnp.where(valid, correct, 0.0), axis=0, keepdims=True)

    @pl.when(t == nt - 1)
    def _finalize():
        loss_part_ref[...] = jnp.broadcast_to(loss_acc[...], (8, 128))
        corr_part_ref[...] = jnp.broadcast_to(corr_acc[...], (8, 128))


def hf_loss_fn(prompt_reps, uttr_a_reps, uttr_b_reps, labs, temp,
               *, max_tile_rows=None,
               vmem_input_budget_bytes=24 * 1024 * 1024):
    """Pallas-backed equivalent of HF_Loss_Fn.forward -> (mean loss, accuracy)."""
    B, D = prompt_reps.shape
    itemsize = jnp.dtype(prompt_reps.dtype).itemsize

    # Batch tile: largest multiple of 8 whose 3 double-buffered input streams
    # fit a conservative VMEM budget (sized for v7x's 64 MiB part; v5e/v6e have
    # 128 MiB and simply run the same comfortable tile).
    if B < 8:
        tb = B                                   # block dim == full array dim
    else:
        rows = max(8, vmem_input_budget_bytes // (3 * 2 * max(D, 1) * itemsize))
        tb = min(1024, rows)
        if max_tile_rows is not None:
            tb = min(tb, max_tile_rows)
        tb = max(8, (tb // 8) * 8)
        tb = min(tb, ((B + 7) // 8) * 8)         # don't tile past the batch

    n_tiles = _cdiv(B, tb)
    ns = 2 if n_tiles >= 2 else 1                # megacore split (v7x); harmless elsewhere
    nt = _cdiv(n_tiles, ns)
    last_blk = n_tiles - 1

    labs2d = labs.reshape(B, 1).astype(jnp.float32)
    exp_temp = jnp.exp(jnp.asarray(temp, jnp.float32)).reshape(1, 1)

    def row_map(s, t):
        # Clamp so overshooting logical tiles never issue OOB DMAs; their rows
        # are masked out in-kernel via the row-id check.
        return (jnp.minimum(s * nt + t, last_blk), 0)

    kernel = functools.partial(_hf_loss_kernel, B)

    loss_parts, corr_parts = pl.pallas_call(
        kernel,
        grid=(ns, nt),
        in_specs=[
            pl.BlockSpec(memory_space=pltpu.SMEM),   # exp(temp) scalar
            pl.BlockSpec((tb, D), row_map),          # prompt_reps
            pl.BlockSpec((tb, D), row_map),          # uttr_a_reps
            pl.BlockSpec((tb, D), row_map),          # uttr_b_reps
            pl.BlockSpec((tb, 1), row_map),          # labs
        ],
        out_specs=(
            pl.BlockSpec((None, 8, 128), lambda s, t: (s, 0, 0)),   # per-shard loss sum
            pl.BlockSpec((None, 8, 128), lambda s, t: (s, 0, 0)),   # per-shard correct sum
        ),
        out_shape=(
            jax.ShapeDtypeStruct((ns, 8, 128), jnp.float32),
            jax.ShapeDtypeStruct((ns, 8, 128), jnp.float32),
        ),
        scratch_shapes=[
            pltpu.VMEM((1, 1), jnp.float32),   # running loss sum
            pltpu.VMEM((1, 1), jnp.float32),   # running correct sum
        ],
        compiler_params=pltpu.CompilerParams(
            dimension_semantics=("parallel", "arbitrary"),
            vmem_limit_bytes=48 * 1024 * 1024,
        ),
    )(exp_temp, prompt_reps, uttr_a_reps, uttr_b_reps, labs2d)

    inv_b = 1.0 / jnp.float32(B)
    loss_mean = jnp.sum(loss_parts[:, 0, 0]) * inv_b
    acc = jnp.sum(corr_parts[:, 0, 0]) * inv_b
    return loss_mean, acc


def _reference(prompt_reps, uttr_a_reps, uttr_b_reps, labs, temp):
    """Pure-JAX reference mirroring the PyTorch forward (fp32 math)."""
    p = prompt_reps.astype(jnp.float32)
    a = uttr_a_reps.astype(jnp.float32)
    b = uttr_b_reps.astype(jnp.float32)
    labs = labs.astype(jnp.float32)

    def cos(x, y):
        dot = jnp.sum(x * y, axis=-1)
        return dot / jnp.maximum(
            jnp.linalg.norm(x, axis=-1) * jnp.linalg.norm(y, axis=-1), EPS)

    sim_a = cos(p, a)
    sim_b = cos(p, b)
    acc = jnp.mean((labs == (sim_b > sim_a).astype(labs.dtype)).astype(jnp.float32))
    margin = (2.0 * labs - 1.0) * (sim_b - sim_a) * jnp.exp(jnp.float32(temp))
    loss = -jnp.log(1.0 / (1.0 + jnp.exp(-margin)))
    return jnp.mean(loss), acc


if __name__ == "__main__":
    key = jax.random.PRNGKey(0)
    temp = jnp.float32(1.0)  # nn.Parameter(torch.tensor(1.0)), deterministic init

    # Case 1: small demo shapes, single tile, lane dim < 128 (no padding).
    k1, k2, k3, k4, key = jax.random.split(key, 5)
    B, D = 8, 32
    prompt_reps = jax.random.normal(k1, (B, D), dtype=jnp.float32)
    uttr_a_reps = jax.random.normal(k2, (B, D), dtype=jnp.float32)
    uttr_b_reps = jax.random.normal(k3, (B, D), dtype=jnp.float32)
    labs = (jax.random.uniform(k4, (B,)) > 0.5).astype(jnp.float32)

    loss, acc = hf_loss_fn(prompt_reps, uttr_a_reps, uttr_b_reps, labs, temp)
    jax.block_until_ready((loss, acc))
    ref_loss, ref_acc = _reference(prompt_reps, uttr_a_reps, uttr_b_reps, labs, temp)
    assert jnp.allclose(loss, ref_loss, rtol=1e-4, atol=1e-5), (loss, ref_loss)
    assert jnp.allclose(acc, ref_acc, rtol=1e-6, atol=1e-6), (acc, ref_acc)

    # Case 2: ragged batch/feature dims, forced multi-tile + 2-shard grid with
    # an odd tile count -> exercises the clamped index_map, partial last tile,
    # masking, accumulator and shard-reduction paths.
    k1, k2, k3, k4, key = jax.random.split(key, 5)
    B2, D2 = 37, 96
    p2 = jax.random.normal(k1, (B2, D2), dtype=jnp.float32)
    a2 = jax.random.normal(k2, (B2, D2), dtype=jnp.float32)
    b2 = jax.random.normal(k3, (B2, D2), dtype=jnp.float32)
    labs2 = (jax.random.uniform(k4, (B2,)) > 0.5).astype(jnp.float32)

    loss2, acc2 = hf_loss_fn(p2, a2, b2, labs2, temp, max_tile_rows=16)
    jax.block_until_ready((loss2, acc2))
    ref_loss2, ref_acc2 = _reference(p2, a2, b2, labs2, temp)
    assert jnp.allclose(loss2, ref_loss2, rtol=1e-4, atol=1e-5), (loss2, ref_loss2)
    assert jnp.allclose(acc2, ref_acc2, rtol=1e-6, atol=1e-6), (acc2, ref_acc2)

    # Case 3: bf16 inputs (half the HBM traffic), multi-shard with one tile
    # per shard; kernel upcasts to fp32 internally.
    k1, k2, k3, k4, key = jax.random.split(key, 5)
    B3, D3 = 64, 256
    p3 = jax.random.normal(k1, (B3, D3), dtype=jnp.bfloat16)
    a3 = jax.random.normal(k2, (B3, D3), dtype=jnp.bfloat16)
    b3 = jax.random.normal(k3, (B3, D3), dtype=jnp.bfloat16)
    labs3 = (jax.random.uniform(k4, (B3,)) > 0.5).astype(jnp.float32)

    loss3, acc3 = hf_loss_fn(p3, a3, b3, labs3, temp, max_tile_rows=32)
    jax.block_until_ready((loss3, acc3))
    ref_loss3, ref_acc3 = _reference(p3, a3, b3, labs3, temp)
    assert jnp.allclose(loss3, ref_loss3, rtol=1e-3, atol=1e-4), (loss3, ref_loss3)
    assert jnp.allclose(acc3, ref_acc3, rtol=1e-6, atol=1e-6), (acc3, ref_acc3)

    print("KERNEL_OK")
</pallas_src>

<mosaic_0001>
module attributes {stable_mosaic.version = 11 : i64} {
  func.func @_hf_loss_kernel(%arg0: i32, %arg1: i32, %arg2: memref<1x1xf32, #tpu.memory_space<smem>>, %arg3: memref<8x32xf32, #tpu.memory_space<vmem>>, %arg4: memref<8x32xf32, #tpu.memory_space<vmem>>, %arg5: memref<8x32xf32, #tpu.memory_space<vmem>>, %arg6: memref<8x1xf32, #tpu.memory_space<vmem>>, %arg7: memref<1x8x128xf32, #tpu.memory_space<vmem>>, %arg8: memref<1x8x128xf32, #tpu.memory_space<vmem>>, %arg9: memref<1x1xf32, #tpu.memory_space<vmem>>, %arg10: memref<1x1xf32, #tpu.memory_space<vmem>>) attributes {dimension_semantics = [#tpu.dimension_semantics<parallel>, #tpu.dimension_semantics<arbitrary>], iteration_bounds = array<i64: 1, 1>, scalar_prefetch = 0 : i64, scratch_operands = 2 : i64, tpu.core_type = #tpu.core_type<tc>, window_params = [{transform_indices = @transform_0, window_bounds = array<i64: 1, 1>}, {transform_indices = @transform_1, window_bounds = array<i64: 8, 32>}, {transform_indices = @transform_2, window_bounds = array<i64: 8, 32>}, {transform_indices = @transform_3, window_bounds = array<i64: 8, 32>}, {transform_indices = @transform_4, window_bounds = array<i64: 8, 1>}, {transform_indices = @transform_5, window_bounds = array<i64: 1, 8, 128>}, {transform_indices = @transform_6, window_bounds = array<i64: 1, 8, 128>}]} {
    %c0_i32 = arith.constant 0 : i32
    %0 = arith.cmpi eq, %arg1, %c0_i32 : i32
    %1 = arith.extui %0 : i1 to i32
    %c0_i32_0 = arith.constant 0 : i32
    %2 = arith.cmpi ne, %1, %c0_i32_0 : i32
    scf.if %2 {
      %cst_37 = arith.constant 0.000000e+00 : f32
      %84 = vector.broadcast %cst_37 : f32 to vector<1x1xf32>
      %c0_38 = arith.constant 0 : index
      %c0_39 = arith.constant 0 : index
      %85 = vector.load %arg9[%c0_38, %c0_39] : memref<1x1xf32, #tpu.memory_space<vmem>>, vector<1x1xf32>
      tpu.vector_store %arg9[%c0_38, %c0_39], %84 {strides = array<i32>} : memref<1x1xf32, #tpu.memory_space<vmem>>, vector<1x1xf32>,
      %cst_40 = arith.constant 0.000000e+00 : f32
      %86 = vector.broadcast %cst_40 : f32 to vector<1x1xf32>
      %c0_41 = arith.constant 0 : index
      %c0_42 = arith.constant 0 : index
      %87 = vector.load %arg10[%c0_41, %c0_42] : memref<1x1xf32, #tpu.memory_space<vmem>>, vector<1x1xf32>
      tpu.vector_store %arg10[%c0_41, %c0_42], %86 {strides = array<i32>} : memref<1x1xf32, #tpu.memory_space<vmem>>, vector<1x1xf32>,
    } else {
    }
    %c0 = arith.constant 0 : index
    %c0_1 = arith.constant 0 : index
    %3 = vector.load %arg3[%c0, %c0_1] : memref<8x32xf32, #tpu.memory_space<vmem>>, vector<8x32xf32>
    %c0_2 = arith.constant 0 : index
    %c0_3 = arith.constant 0 : index
    %4 = vector.load %arg4[%c0_2, %c0_3] : memref<8x32xf32, #tpu.memory_space<vmem>>, vector<8x32xf32>
    %c0_4 = arith.constant 0 : index
    %c0_5 = arith.constant 0 : index
    %5 = vector.load %arg5[%c0_4, %c0_5] : memref<8x32xf32, #tpu.memory_space<vmem>>, vector<8x32xf32>
    %c0_6 = arith.constant 0 : index
    %c0_7 = arith.constant 0 : index
    %6 = vector.load %arg6[%c0_6, %c0_7] : memref<8x1xf32, #tpu.memory_space<vmem>>, vector<8x1xf32>
    %7 = arith.mulf %3, %4 : vector<8x32xf32>
    %cst = arith.constant dense<0.000000e+00> : vector<8xf32>
    %8 = vector.multi_reduction <add>, %7, %cst [1] : vector<8x32xf32> to vector<8xf32>
    %9 = vector.shape_cast %8 : vector<8xf32> to vector<8x1xf32>
    %10 = arith.mulf %3, %5 : vector<8x32xf32>
    %cst_8 = arith.constant dense<0.000000e+00> : vector<8xf32>
    %11 = vector.multi_reduction <add>, %10, %cst_8 [1] : vector<8x32xf32> to vector<8xf32>
    %12 = vector.shape_cast %11 : vector<8xf32> to vector<8x1xf32>
    %13 = arith.mulf %3, %3 : vector<8x32xf32>
    %cst_9 = arith.constant dense<0.000000e+00> : vector<8xf32>
    %14 = vector.multi_reduction <add>, %13, %cst_9 [1] : vector<8x32xf32> to vector<8xf32>
    %15 = vector.shape_cast %14 : vector<8xf32> to vector<8x1xf32>
    %16 = arith.mulf %4, %4 : vector<8x32xf32>
    %cst_10 = arith.constant dense<0.000000e+00> : vector<8xf32>
    %17 = vector.multi_reduction <add>, %16, %cst_10 [1] : vector<8x32xf32> to vector<8xf32>
    %18 = vector.shape_cast %17 : vector<8xf32> to vector<8x1xf32>
    %19 = arith.mulf %5, %5 : vector<8x32xf32>
    %cst_11 = arith.constant dense<0.000000e+00> : vector<8xf32>
    %20 = vector.multi_reduction <add>, %19, %cst_11 [1] : vector<8x32xf32> to vector<8xf32>
    %21 = vector.shape_cast %20 : vector<8xf32> to vector<8x1xf32>
    %22 = arith.mulf %15, %18 : vector<8x1xf32>
    %cst_12 = arith.constant 1.000000e-16 : f32
    %23 = vector.broadcast %cst_12 : f32 to vector<8x1xf32>
    %24 = arith.maximumf %22, %23 : vector<8x1xf32>
    %25 = math.rsqrt %24 : vector<8x1xf32>
    %26 = arith.mulf %9, %25 : vector<8x1xf32>
    %27 = arith.mulf %15, %21 : vector<8x1xf32>
    %cst_13 = arith.constant 1.000000e-16 : f32
    %28 = vector.broadcast %cst_13 : f32 to vector<8x1xf32>
    %29 = arith.maximumf %27, %28 : vector<8x1xf32>
    %30 = math.rsqrt %29 : vector<8x1xf32>
    %31 = arith.mulf %12, %30 : vector<8x1xf32>
    %32 = arith.cmpf ogt, %31, %26 : vector<8x1xf32>
    %33 = arith.extui %32 : vector<8x1xi1> to vector<8x1xi32>
    %34 = arith.sitofp %33 : vector<8x1xi32> to vector<8x1xf32>
    %35 = arith.cmpf oeq, %6, %34 : vector<8x1xf32>
    %36 = arith.extui %35 : vector<8x1xi1> to vector<8x1xi32>
    %37 = arith.sitofp %36 : vector<8x1xi32> to vector<8x1xf32>
    %c0_14 = arith.constant 0 : index
    %c0_15 = arith.constant 0 : index
    %38 = memref.load %arg2[%c0_14, %c0_15] : memref<1x1xf32, #tpu.memory_space<smem>>
    %cst_16 = arith.constant 2.000000e+00 : f32
    %39 = vector.broadcast %cst_16 : f32 to vector<8x1xf32>
    %40 = arith.mulf %39, %6 : vector<8x1xf32>
    %cst_17 = arith.constant 1.000000e+00 : f32
    %41 = vector.broadcast %cst_17 : f32 to vector<8x1xf32>
    %42 = arith.subf %40, %41 : vector<8x1xf32>
    %43 = arith.subf %31, %26 : vector<8x1xf32>
    %44 = arith.mulf %42, %43 : vector<8x1xf32>
    %45 = vector.broadcast %38 : f32 to vector<8x1xf32>
    %46 = arith.mulf %44, %45 : vector<8x1xf32>
    %cst_18 = arith.constant 0.000000e+00 : f32
    %47 = vector.broadcast %cst_18 : f32 to vector<8x1xf32>
    %48 = arith.subf %47, %46 : vector<8x1xf32>
    %cst_19 = arith.constant 0.000000e+00 : f32
    %49 = vector.broadcast %cst_19 : f32 to vector<8x1xf32>
    %50 = arith.maximumf %48, %49 : vector<8x1xf32>
    %51 = math.absf %46 : vector<8x1xf32>
    %cst_20 = arith.constant 0.000000e+00 : f32
    %52 = vector.broadcast %cst_20 : f32 to vector<8x1xf32>
    %53 = arith.subf %52, %51 : vector<8x1xf32>
    %54 = math.exp %53 : vector<8x1xf32>
    %cst_21 = arith.constant 1.000000e+00 : f32
    %55 = vector.broadcast %cst_21 : f32 to vector<8x1xf32>
    %56 = arith.addf %55, %54 : vector<8x1xf32>
    %57 = math.log %56 : vector<8x1xf32>
    %58 = arith.addf %50, %57 : vector<8x1xf32>
    %c1_i32 = arith.constant 1 : i32
    %59 = arith.muli %arg0, %c1_i32 : i32
    %60 = arith.addi %59, %arg1 : i32
    %c8_i32 = arith.constant 8 : i32
    %61 = arith.muli %60, %c8_i32 : i32
    %62 = tpu.iota {dimensions = array<i32: 0>} : vector<8x1xi32>
    %63 = vector.broadcast %61 : i32 to vector<8x1xi32>
    %64 = arith.addi %63, %62 : vector<8x1xi32>
    %c8_i32_22 = arith.constant 8 : i32
    %65 = vector.broadcast %c8_i32_22 : i32 to vector<8x1xi32>
    %66 = arith.cmpi slt, %64, %65 : vector<8x1xi32>
    %c0_23 = arith.constant 0 : index
    %c0_24 = arith.constant 0 : index
    %67 = vector.load %arg9[%c0_23, %c0_24] : memref<1x1xf32, #tpu.memory_space<vmem>>, vector<1x1xf32>
    %cst_25 = arith.constant 0.000000e+00 : f32
    %68 = vector.broadcast %cst_25 : f32 to vector<8x1xf32>
    %69 = arith.select %66, %58, %68 : vector<8x1xi1>, vector<8x1xf32>
    %cst_26 = arith.constant dense<0.000000e+00> : vector<1xf32>
    %70 = vector.multi_reduction <add>, %69, %cst_26 [0] : vector<8x1xf32> to vector<1xf32>
    %71 = vector.shape_cast %70 : vector<1xf32> to vector<1x1xf32>
    %72 = arith.addf %67, %71 : vector<1x1xf32>
    %c0_27 = arith.constant 0 : index
    %c0_28 = arith.constant 0 : index
    %73 = vector.load %arg9[%c0_27, %c0_28] : memref<1x1xf32, #tpu.memory_space<vmem>>, vector<1x1xf32>
    tpu.vector_store %arg9[%c0_27, %c0_28], %72 {strides = array<i32>} : memref<1x1xf32, #tpu.memory_space<vmem>>, vector<1x1xf32>,
    %c0_29 = arith.constant 0 : index
    %c0_30 = arith.constant 0 : index
    %74 = vector.load %arg10[%c0_29, %c0_30] : memref<1x1xf32, #tpu.memory_space<vmem>>, vector<1x1xf32>
    %cst_31 = arith.constant 0.000000e+00 : f32
    %75 = vector.broadcast %cst_31 : f32 to vector<8x1xf32>
    %76 = arith.select %66, %37, %75 : vector<8x1xi1>, vector<8x1xf32>
    %cst_32 = arith.constant dense<0.000000e+00> : vector<1xf32>
    %77 = vector.multi_reduction <add>, %76, %cst_32 [0] : vector<8x1xf32> to vector<1xf32>
    %78 = vector.shape_cast %77 : vector<1xf32> to vector<1x1xf32>
    %79 = arith.addf %74, %78 : vector<1x1xf32>
    %c0_33 = arith.constant 0 : index
    %c0_34 = arith.constant 0 : index
    %80 = vector.load %arg10[%c0_33, %c0_34] : memref<1x1xf32, #tpu.memory_space<vmem>>, vector<1x1xf32>
    tpu.vector_store %arg10[%c0_33, %c0_34], %79 {strides = array<i32>} : memref<1x1xf32, #tpu.memory_space<vmem>>, vector<1x1xf32>,
    %c0_i32_35 = arith.constant 0 : i32
    %81 = arith.cmpi eq, %arg1, %c0_i32_35 : i32
    %82 = arith.extui %81 : i1 to i32
    %c0_i32_36 = arith.constant 0 : i32
    %83 = arith.cmpi ne, %82, %c0_i32_36 : i32
    scf.if %83 {
      %c0_37 = arith.constant 0 : index
      %c0_38 = arith.constant 0 : index
      %84 = vector.load %arg9[%c0_37, %c0_38] : memref<1x1xf32, #tpu.memory_space<vmem>>, vector<1x1xf32>
      %85 = vector.shape_cast %84 : vector<1x1xf32> to vector<1x1xf32>
      %86 = vector.broadcast %85 : vector<1x1xf32> to vector<8x128xf32>
      %c0_39 = arith.constant 0 : index
      %c0_40 = arith.constant 0 : index
      %c0_41 = arith.constant 0 : index
      %87 = vector.load %arg7[%c0_39, %c0_40, %c0_41] : memref<1x8x128xf32, #tpu.memory_space<vmem>>, vector<1x8x128xf32>
      %88 = vector.shape_cast %87 : vector<1x8x128xf32> to vector<8x128xf32>
      %89 = vector.shape_cast %86 : vector<8x128xf32> to vector<1x8x128xf32>
      tpu.vector_store %arg7[%c0_39, %c0_40, %c0_41], %89 {strides = array<i32>} : memref<1x8x128xf32, #tpu.memory_space<vmem>>, vector<1x8x128xf32>,
      %c0_42 = arith.constant 0 : index
      %c0_43 = arith.constant 0 : index
      %90 = vector.load %arg10[%c0_42, %c0_43] : memref<1x1xf32, #tpu.memory_space<vmem>>, vector<1x1xf32>
      %91 = vector.shape_cast %90 : vector<1x1xf32> to vector<1x1xf32>
      %92 = vector.broadcast %91 : vector<1x1xf32> to vector<8x128xf32>
      %c0_44 = arith.constant 0 : index
      %c0_45 = arith.constant 0 : index
      %c0_46 = arith.constant 0 : index
      %93 = vector.load %arg8[%c0_44, %c0_45, %c0_46] : memref<1x8x128xf32, #tpu.memory_space<vmem>>, vector<1x8x128xf32>
      %94 = vector.shape_cast %93 : vector<1x8x128xf32> to vector<8x128xf32>
      %95 = vector.shape_cast %92 : vector<8x128xf32> to vector<1x8x128xf32>
      tpu.vector_store %arg8[%c0_44, %c0_45, %c0_46], %95 {strides = array<i32>} : memref<1x8x128xf32, #tpu.memory_space<vmem>>, vector<1x8x128xf32>,
    } else {
    }
    return
  }
  func.func @transform_0(%arg0: i32, %arg1: i32) -> (i32, i32) {
    %c0_i32 = arith.constant 0 : i32
    %c0_i32_0 = arith.constant 0 : i32
    %c0_i32_1 = arith.constant 0 : i32
    return %c0_i32, %c0_i32_0 : i32, i32
  }
  func.func @transform_1(%arg0: i32, %arg1: i32) -> (i32, i32) {
    %c1_i32 = arith.constant 1 : i32
    %0 = arith.muli %arg0, %c1_i32 : i32
    %1 = arith.addi %0, %arg1 : i32
    %c0_i32 = arith.constant 0 : i32
    %2 = arith.minsi %1, %c0_i32 : i32
    %c0_i32_0 = arith.constant 0 : i32
    %c0_i32_1 = arith.constant 0 : i32
    return %2, %c0_i32_0 : i32, i32
  }
  func.func @transform_2(%arg0: i32, %arg1: i32) -> (i32, i32) {
    %c1_i32 = arith.constant 1 : i32
    %0 = arith.muli %arg0, %c1_i32 : i32
    %1 = arith.addi %0, %arg1 : i32
    %c0_i32 = arith.constant 0 : i32
    %2 = arith.minsi %1, %c0_i32 : i32
    %c0_i32_0 = arith.constant 0 : i32
    %c0_i32_1 = arith.constant 0 : i32
    return %2, %c0_i32_0 : i32, i32
  }
  func.func @transform_3(%arg0: i32, %arg1: i32) -> (i32, i32) {
    %c1_i32 = arith.constant 1 : i32
    %0 = arith.muli %arg0, %c1_i32 : i32
    %1 = arith.addi %0, %arg1 : i32
    %c0_i32 = arith.constant 0 : i32
    %2 = arith.minsi %1, %c0_i32 : i32
    %c0_i32_0 = arith.constant 0 : i32
    %c0_i32_1 = arith.constant 0 : i32
    return %2, %c0_i32_0 : i32, i32
  }
  func.func @transform_4(%arg0: i32, %arg1: i32) -> (i32, i32) {
    %c1_i32 = arith.constant 1 : i32
    %0 = arith.muli %arg0, %c1_i32 : i32
    %1 = arith.addi %0, %arg1 : i32
    %c0_i32 = arith.constant 0 : i32
    %2 = arith.minsi %1, %c0_i32 : i32
    %c0_i32_0 = arith.constant 0 : i32
    %c0_i32_1 = arith.constant 0 : i32
    return %2, %c0_i32_0 : i32, i32
  }
  func.func @transform_5(%arg0: i32, %arg1: i32) -> (i32, i32, i32) {
    %c0_i32 = arith.constant 0 : i32
    %c0_i32_0 = arith.constant 0 : i32
    %c0_i32_1 = arith.constant 0 : i32
    return %arg0, %c0_i32, %c0_i32_0 : i32, i32, i32
  }
  func.func @transform_6(%arg0: i32, %arg1: i32) -> (i32, i32, i32) {
    %c0_i32 = arith.constant 0 : i32
    %c0_i32_0 = arith.constant 0 : i32
    %c0_i32_1 = arith.constant 0 : i32
    return %arg0, %c0_i32, %c0_i32_0 : i32, i32, i32
  }
}

</mosaic_0001>

<bundles_post_ra>
// kernel: tpu_custom_call.1
= control target key start
LH: loop header
LB: loop body
LE: loop exit
PB: predicated region body
PF: predicated region fallthrough
CT: control target
= control target key end

     0   :  { %13 = vsyncpa [#allocation6], 0  ;;  %s497_s0 = inlined_call_operand.<no memory space> [shape: f32[1,1], index: 0, kind: input, shape index: {}]   ;;  %s498_s1 = inlined_call_operand.vmem [shape: f32[8,32], index: 1, kind: input, shape index: {}]   ;;  %s499_s2 = inlined_call_operand.hbm [shape: f32[8,32], index: 2, kind: input, shape index: {}]   ;;  %s500_s3 = inlined_call_operand.hbm [shape: f32[8,32], index: 3, kind: input, shape index: {}]   ;;  %s501_s4 = inlined_call_operand.vmem [shape: f32[8,1], index: 4, kind: input, shape index: {}]   ;;  %s502_s5 = inlined_call_operand.hbm [shape: f32[1,8,128], index: 5, kind: output, shape index: {0}]   ;;  %s503_s6 = inlined_call_operand.hbm [shape: f32[1,8,128], index: 6, kind: output, shape index: {1}]  }
   0x1   :  { %14 = vsyncpa [#allocation9], 0 }
   0x2   :  { %15 = vsyncpa [#allocation7], 0 }
   0x3   :  { %16 = vsyncpa [#allocation12], 0  ;;  %s41_s23 = sshll.u32 %s499_s2, 4  ;;  %s429_s24 = smov [#allocation5]   ;;  %s42_s23 = int_to_ptr.hbm [resolvable:$true] %s41_s23 }
   0x4   :  { %s43_s25 = sshll.u32 %s429_s24, 4  ;;  %s57_s28 = sshll.u32 %s500_s3, 4  ;;  %s44_s25 = int_to_ptr.vmem [resolvable:$true] %s43_s25  ;;  %s58_s28 = int_to_ptr.hbm [resolvable:$true] %s57_s28 }
   0x5   :  { %46 = dma.hbm_to_vmem [thread:$0]  %s42_s23, 128, %s44_s25, [#allocation6]  }
   0x6   :  { %s430_s29 = smov [#allocation8]  }
   0x7   :  { %s59_s30 = sshll.u32 %s430_s29, 4  ;;  %s60_s30 = int_to_ptr.vmem [resolvable:$true] %s59_s30 }
   0x8   :  { %62 = dma.hbm_to_vmem [thread:$0]  %s58_s28, 128, %s60_s30, [#allocation9]  }
   0x9   :  { %421 = dma.done.wait [#allocation6], 128  }
   0xa   :  { %422 = vsyncadd [#allocation6], 4294967168 }
   0xb   :  { %423 = dma.done.wait [#allocation9], 128  }
   0xc   :  { %424 = vsyncadd [#allocation9], 4294967168  ;;  %v132_v0 = vld [vmem:[#allocation8] sm:$0xff]  ;;  %vm135_vm0 = vcmask 261120   ;;  %v130_v1 = vld [vmem:[%s498_s1] sm:$0xff]  ;;  %vm127_vm1 = vcmask 0   ;;  %v192_v44 = vstv %s497_s0 }
   0xd   :  { %v151_v2 = vmul.f32 %v132_v0, %v132_v0  ;;  %v143_v3 = vmul.f32 %v130_v1, %v130_v1  ;;  %v139_v4 = vmul.f32 %v132_v0, %v130_v1  ;;  %v131_v5 = vld [vmem:[#allocation5] sm:$0xff]  ;;  %v431_v13 = vmov 0.0   ;;  %s433_s0 = smov [#allocation11]   ;;  %s272_s12 = sshll.u32 %s503_s6, 4  ;;  %s273_s12 = int_to_ptr.hbm [resolvable:$true] %s272_s12 }
   0xe   :  { %v147_v9 = vmul.f32 %v131_v5, %v131_v5  ;;  %v134_v10 = vmul.f32 %v131_v5, %v130_v1  ;;  %128 = vst.msk [vmem:[#allocation2] sm:$0x1] %vm127_vm1, %v431_v13  ;;  %v133_v31 = vld [vmem:[%s501_s4] sm:$0xff]  ;;  %v432_v38 = vmov 0   ;;  %vm213_vm9 = vcmask 7168   ;;  %s270_s9 = sshll.u32 %s433_s0, 4  ;;  %s271_s9 = int_to_ptr.vmem [resolvable:$true] %s270_s9 }
   0xf   :  { %v152_v6 = vsel %vm135_vm0, %v151_v2, 0.0  ;;  %v144_v7 = vsel %vm135_vm0, %v143_v3, 0.0  ;;  %v140_v8 = vsel %vm135_vm0, %v139_v4, 0.0  ;;  %129 = vst.msk [vmem:[#allocation3] sm:$0x1] %vm127_vm1, %v431_v13  ;;  %v188_v33 = vmul.f32 2.0, %v133_v31  ;;  %314 = vset.pattern.permute.xlu0 %v432_v38  ;;  %313 = vset.pattern.permute.xlu2 %v432_v38 }
  0x10   :  { %153 = vadd.xlane.f32.xlu1 %v152_v6  ;;  %145 = vadd.xlane.f32.xlu0 %v144_v7  ;;  %v148_v11 = vsel %vm135_vm0, %v147_v9, 0.0  ;;  %v136_v12 = vsel %vm135_vm0, %v134_v10, 0.0  ;;  %s434_s13 = smov [#allocation10]   ;;  %s261_s17 = sshll.u32 %s502_s5, 4  ;;  %s262_s17 = int_to_ptr.hbm [resolvable:$true] %s261_s17 }
  0x11   :  { %141 = vadd.xlane.f32.xlu2 %v140_v8  ;;  %v306_v41 = vadd.f32 -1.0, %v188_v33  ;;  %s259_s14 = sshll.u32 %s434_s13, 4  ;;  %s260_s14 = int_to_ptr.vmem [resolvable:$true] %s259_s14 }
  0x16   :  { %v224_v58 = vld [vmem:[#allocation3] sm:$0x1] }
  0x18   :  { %149 = vadd.xlane.f32.xlu0 %v148_v11  ;;  %137 = vadd.xlane.f32.xlu1 %v136_v12  ;;  %v211_v11 = vld [vmem:[#allocation2] sm:$0x1] }
  0x83   :  { %v154_v14 = vpop.xlane.xlu1 %153  ;;  %v146_v15 = vpop.xlane.xlu0 %145 }
  0x84   :  { %v168_v16 = vmul.f32 %v154_v14, %v146_v15  ;;  %v142_v35 = vpop.xlane.xlu2 %141 }
  0x86   :  { %v169_v17 = vmax.f32 %v168_v16, 1e-16 }
  0x88   :  { %317 = vrsqrt.f32 %v169_v17  ;;  %vm176_vm3 = vweird.f32 %v169_v17 }
  0x8b   :  { %v150_v18 = vpop.xlane.xlu0 %149  ;;  %v138_v37 = vpop.xlane.xlu1 %137 }
  0x8c   :  { %v155_v19 = vmul.f32 %v150_v18, %v146_v15 }
  0x8e   :  { %v318_v20 = vpop.eup %317  ;;  %v156_v21 = vmax.f32 %v155_v19, 1e-16 }
  0x8f   :  { %v171_v22 = vmul.f32 %v318_v20, %v169_v17  ;;  %vm177_vm2 = vweird.f32 %v318_v20 }
  0x90   :  { %319 = vrsqrt.f32 %v156_v21  ;;  %vm178_vm5 = vmor %vm176_vm3, %vm177_vm2  ;;  %vm163_vm6 = vweird.f32 %v156_v21 }
  0x91   :  { %v172_v23 = vmul.f32 %v318_v20, %v171_v22 }
  0x93   :  { %v173_v24 = vmul.f32 0.5, %v172_v23 }
  0x95   :  { %v174_v27 = vsub.f32 1.5, %v173_v24 }
  0x96   :  { %v320_v25 = vpop.eup %319 }
  0x97   :  { %v158_v26 = vmul.f32 %v320_v25, %v156_v21  ;;  %v175_v30 = vmul.f32 %v318_v20, %v174_v27  ;;  %vm164_vm4 = vweird.f32 %v320_v25 }
  0x98   :  { %vm165_vm7 = vmor %vm163_vm6, %vm164_vm4 }
  0x99   :  { %v159_v28 = vmul.f32 %v320_v25, %v158_v26  ;;  %v179_v34 = vsel %vm178_vm5, %v318_v20, %v175_v30 }
  0x9a   :  { %v180_v40 = vmul.f32 %v179_v34, %v142_v35 }
  0x9b   :  { %v160_v29 = vmul.f32 0.5, %v159_v28 }
  0x9d   :  { %v161_v32 = vsub.f32 1.5, %v160_v29 }
  0x9f   :  { %v162_v36 = vmul.f32 %v320_v25, %v161_v32 }
  0xa1   :  { %v166_v39 = vsel %vm165_vm7, %v320_v25, %v162_v36 }
  0xa2   :  { %v167_v42 = vmul.f32 %v166_v39, %v138_v37 }
  0xa4   :  { %vm181_vm8 = vcmp.gt.f32.partialorder %v180_v40, %v167_v42  ;;  %v190_v43 = vsub.f32 %v180_v40, %v167_v42 }
  0xa5   :  { %v304_v45 = vsel %vm181_vm8, 1.0, %v431_v13 }
  0xa6   :  { %vm184_vm10 = vcmp.eq.f32.partialorder %v133_v31, %v304_v45  ;;  %v191_v46 = vmul.f32 %v306_v41, %v190_v43 }
  0xa7   :  { %v305_v47 = vsel %vm184_vm10, 1.0, %v431_v13 }
  0xa8   :  { %v193_v48 = vmul.f32 %v192_v44, %v191_v46  ;;  %v226_v49 = vsel %vm213_vm9, %v305_v47, 0.0 }
  0xa9   :  { %v227_v50 = vrot.slane %v226_v49, 4 }
  0xaa   :  { %v196_v51 = vand.u32 2147483647, %v193_v48  ;;  %v194_v63 = vsub.f32 0.0, %v193_v48 }
  0xab   :  { %v228_v52 = vadd.f32 %v227_v50, %v226_v49 }
  0xac   :  { %v197_v53 = vsub.f32 0.0, %v196_v51  ;;  %v195_v2 = vmax.f32 %v194_v63, 0.0 }
  0xad   :  { %v229_v54 = vrot.slane %v228_v52, 2 }
  0xae   :  { %v198_v55 = vmul.f32 1.442695, %v197_v53 }
  0xaf   :  { %v230_v56 = vadd.f32 %v229_v54, %v228_v52 }
  0xb0   :  { %321 = vpow2.f32 %v198_v55 }
  0xb1   :  { %v231_v57 = vrot.slane %v230_v56, 1 }
  0xb3   :  { %v232_v59 = vadd.f32 %v231_v57, %v230_v56 }
  0xb5   :  { %v233_v60 = vadd.f32 %v232_v59, %v224_v58 }
  0xb6   :  { %v322_v61 = vpop.eup %321 }
  0xb7   :  { %v200_v62 = vadd.f32 1.0, %v322_v61  ;;  %234 = vst.msk [vmem:[#allocation3] sm:$0x1] %vm127_vm1, %v233_v60 }
  0xb9   :  { %323 = vlog2.f32 %v200_v62 }
  0xbe   :  { %v315_v0 = vld [vmem:[#allocation3] ss:$0 sm:$0xff] }
  0xbf   :  { %v324_v1 = vpop.eup %323  ;;  %250 = vperm.xlu0 %314, %v315_v0  }
  0xc0   :  { %v202_v3 = vmul.f32 0.6931472, %v324_v1 }
  0xc2   :  { %v203_v4 = vadd.f32 %v202_v3, %v195_v2 }
  0xc4   :  { %v214_v5 = vsel %vm213_vm9, %v203_v4, 0.0 }
  0xc5   :  { %v215_v6 = vrot.slane %v214_v5, 4 }
  0xc7   :  { %v216_v7 = vadd.f32 %v215_v6, %v214_v5 }
  0xc9   :  { %v217_v8 = vrot.slane %v216_v7, 2 }
  0xcb   :  { %v218_v9 = vadd.f32 %v217_v8, %v216_v7 }
  0xcd   :  { %v219_v10 = vrot.slane %v218_v9, 1 }
  0xcf   :  { %v220_v12 = vadd.f32 %v219_v10, %v218_v9 }
  0xd1   :  { %v221_v13 = vadd.f32 %v220_v12, %v211_v11 }
  0xd3   :  { %223 = vst.msk [vmem:[#allocation2] sm:$0x1] %vm127_vm1, %v221_v13 }
  0xda   :  { %v316_v14 = vld [vmem:[#allocation2] ss:$0 sm:$0xff] }
  0xdb   :  { %242 = vperm.xlu2 %313, %v316_v14  }
 0x131   :  { %v251_v15 = vpop.permute.xlu0 %250 }
 0x132   :  { %253 = vst [vmem:[#allocation11] sm:$0xff] %v251_v15 }
 0x133   :  { %275 = dma.vmem_to_hbm [thread:$0]  %s271_s9, 128, %s273_s12, [#allocation12]  }
 0x135   :  { %v243_v16 = vpop.permute.xlu2 %242 }
 0x136   :  { %245 = vst [vmem:[#allocation10] sm:$0xff] %v243_v16 }
 0x137   :  { %264 = dma.vmem_to_hbm [thread:$0]  %s260_s14, 128, %s262_s17, [#allocation7]  }
 0x138   :  { %425 = dma.done.wait [#allocation7], 128  }
 0x139   :  { %426 = vsyncadd [#allocation7], 4294967168 }
 0x13a   :  { %427 = dma.done.wait [#allocation12], 128  }
 0x13b   :  { %428 = vsyncadd [#allocation12], 4294967168 }
 0x13c   :  { %284 = vsyncpa [#allocation6], 1 }
 0x13d   :  { %285 = vsyncpa [#allocation9], 1 }
 0x13e   :  { %286 = vsyncpa [#allocation7], 1 }
 0x13f   :  { %287 = vsyncpa [#allocation12], 1 }

</bundles_post_ra>
